<compile_context>
chip_gen: v6e
topology: v6e:2x2x1
jax: 0.10.0
libtpu: 0.0.40
codegen_flags: <defaults>
</compile_context>

<pallas_src>
import jax
import jax.numpy as jnp
from jax.experimental import pallas as pl
from jax.experimental.pallas import tpu as pltpu


def _ffn_kernel(x_ref, w1_ref, b1_ref, w2_ref, b2_ref, o_ref):
    x = x_ref[...]                                                  # (TN, Dp) bf16

    # h = GELU(x @ W1^T + b1), exact (erf) GELU = PyTorch nn.GELU() default.
    h = jnp.dot(x, w1_ref[...], preferred_element_type=jnp.float32) + b1_ref[...]
    h = 0.5 * h * (1.0 + jax.lax.erf(h * 0.7071067811865475))       # f32 on VPU/EUP

    # y = h @ W2^T + b2   (bf16 operands, f32 accumulation)
    y = jnp.dot(h.astype(w2_ref.dtype), w2_ref[...],
                preferred_element_type=jnp.float32)
    o_ref[...] = (y + b2_ref[...]).astype(o_ref.dtype)


def _round_up(x, m):
    return (x + m - 1) // m * m


def feed_forward(x, params, *, row_tile=512):
    """x: (B, S, D) float32. params: PyTorch-layout Linear weights. Returns (B, S, D)."""
    B, S, D = x.shape
    F = params["w1"].shape[0]
    N = B * S

    # Lane-dense feature dims (multiples of 128). No-op when D/F already aligned.
    Dp = _round_up(D, 128)
    Fp = _round_up(F, 128)

    # Large row tiles; multiple of 16 for bf16 sublane packing; pad the tail.
    row_tile = _round_up(min(row_tile, _round_up(N, 16)), 16)
    Np = _round_up(N, row_tile)
    grid = (Np // row_tile,)

    x2d = x.reshape(N, D)
    x_p = jnp.pad(x2d, ((0, Np - N), (0, Dp - D))).astype(jnp.bfloat16)

    # PyTorch Linear stores (out, in); pass transposed so matmuls are x @ W.
    w1_p = jnp.pad(params["w1"].T, ((0, Dp - D), (0, Fp - F))).astype(jnp.bfloat16)
    b1_p = jnp.pad(params["b1"].reshape(1, F), ((0, 0), (0, Fp - F))).astype(jnp.float32)
    w2_p = jnp.pad(params["w2"].T, ((0, Fp - F), (0, Dp - D))).astype(jnp.bfloat16)
    b2_p = jnp.pad(params["b2"].reshape(1, D), ((0, 0), (0, Dp - D))).astype(jnp.float32)

    const = lambda shape: pl.BlockSpec(shape, lambda i: (0, 0))

    # Roofline hint for XLA scheduling around the custom call.
    cost = pl.CostEstimate(
        flops=2 * Np * Dp * Fp + 2 * Np * Fp * Dp,
        transcendentals=Np * Fp,                       # erf in GELU
        bytes_accessed=(x_p.size * 2 + w1_p.size * 2 + w2_p.size * 2
                        + b1_p.size * 4 + b2_p.size * 4 + Np * Dp * 4),
    )

    # Explicit VMEM budget with headroom (double-buffered row tiles + weights).
    vmem_need = (2 * row_tile * Dp * 2          # x tiles (bf16, double-buffered)
                 + 2 * row_tile * Dp * 4        # out tiles (f32, double-buffered)
                 + 2 * (Dp * Fp + Fp * Dp) * 2  # bf16 weights (worst-case 2 copies)
                 + 4 * (Fp + Dp) * 4            # biases
                 + row_tile * Fp * 4)           # hidden intermediate
    vmem_limit = int(max(32 * 1024 * 1024, min(64 * 1024 * 1024, 2 * vmem_need)))

    out_p = pl.pallas_call(
        _ffn_kernel,
        out_shape=jax.ShapeDtypeStruct((Np, Dp), jnp.float32),
        grid_spec=pltpu.PrefetchScalarGridSpec(
            num_scalar_prefetch=0,
            grid=grid,
            in_specs=[
                pl.BlockSpec((row_tile, Dp), lambda i: (i, 0)),   # x rows
                const((Dp, Fp)),    # W1^T
                const((1, Fp)),     # b1
                const((Fp, Dp)),    # W2^T
                const((1, Dp)),     # b2
            ],
            out_specs=pl.BlockSpec((row_tile, Dp), lambda i: (i, 0)),
        ),
        compiler_params=pltpu.CompilerParams(
            dimension_semantics=("parallel",),
            vmem_limit_bytes=vmem_limit,
        ),
        cost_estimate=cost,
    )(x_p, w1_p, b1_p, w2_p, b2_p)

    return out_p[:N, :D].reshape(B, S, D)


def _reference(x, params):
    """Pure-jnp f32 replica of the PyTorch forward (eval mode)."""
    B, S, D = x.shape
    xf = x.reshape(-1, D)
    h = xf @ params["w1"].T + params["b1"]
    h = 0.5 * h * (1.0 + jax.scipy.special.erf(h / jnp.sqrt(2.0)))
    y = h @ params["w2"].T + params["b2"]
    return y.reshape(B, S, D)


def init_params(key, d_model, d_ff):
    k1, k2, k3, k4 = jax.random.split(key, 4)
    lim1 = 1.0 / (d_model ** 0.5)
    lim2 = 1.0 / (d_ff ** 0.5)
    return {
        "w1": jax.random.uniform(k1, (d_ff, d_model), jnp.float32, -lim1, lim1),
        "b1": jax.random.uniform(k2, (d_ff,), jnp.float32, -lim1, lim1),
        "w2": jax.random.uniform(k3, (d_model, d_ff), jnp.float32, -lim2, lim2),
        "b2": jax.random.uniform(k4, (d_model,), jnp.float32, -lim2, lim2),
    }


if __name__ == "__main__":
    B, S, D_MODEL, D_FF = 2, 8, 32, 128
    key = jax.random.PRNGKey(0)
    kx, kp = jax.random.split(key)
    x = jax.random.normal(kx, (B, S, D_MODEL), jnp.float32)
    params = init_params(kp, D_MODEL, D_FF)

    out = feed_forward(x, params)
    out = jax.block_until_ready(out)

    ref = _reference(x, params)
    assert out.shape == (B, S, D_MODEL)
    # bf16 matmul operands -> slightly looser tolerance vs the f32 reference.
    assert jnp.allclose(out, ref, rtol=5e-2, atol=5e-2), "mismatch vs reference"
    print("KERNEL_OK")
</pallas_src>

<mosaic_0001>
module attributes {stable_mosaic.version = 11 : i64} {
  func.func @_ffn_kernel(%arg0: i32, %arg1: memref<16x128xbf16, #tpu.memory_space<vmem>>, %arg2: memref<128x128xbf16, #tpu.memory_space<vmem>>, %arg3: memref<1x128xf32, #tpu.memory_space<vmem>>, %arg4: memref<128x128xbf16, #tpu.memory_space<vmem>>, %arg5: memref<1x128xf32, #tpu.memory_space<vmem>>, %arg6: memref<16x128xf32, #tpu.memory_space<vmem>>) attributes {dimension_semantics = [#tpu.dimension_semantics<parallel>], iteration_bounds = array<i64: 1>, scalar_prefetch = 0 : i64, scratch_operands = 0 : i64, tpu.core_type = #tpu.core_type<tc>, window_params = [{transform_indices = @transform_0, window_bounds = array<i64: 16, 128>}, {pipeline_mode = #tpu.pipeline_mode<synchronous>, transform_indices = @transform_1, window_bounds = array<i64: 128, 128>}, {pipeline_mode = #tpu.pipeline_mode<synchronous>, transform_indices = @transform_2, window_bounds = array<i64: 1, 128>}, {pipeline_mode = #tpu.pipeline_mode<synchronous>, transform_indices = @transform_3, window_bounds = array<i64: 128, 128>}, {pipeline_mode = #tpu.pipeline_mode<synchronous>, transform_indices = @transform_4, window_bounds = array<i64: 1, 128>}, {transform_indices = @transform_5, window_bounds = array<i64: 16, 128>}]} {
    %c0 = arith.constant 0 : index
    %c0_0 = arith.constant 0 : index
    %0 = vector.load %arg1[%c0, %c0_0] : memref<16x128xbf16, #tpu.memory_space<vmem>>, vector<16x128xbf16>
    %c0_1 = arith.constant 0 : index
    %c0_2 = arith.constant 0 : index
    %1 = vector.load %arg2[%c0_1, %c0_2] : memref<128x128xbf16, #tpu.memory_space<vmem>>, vector<128x128xbf16>
    %cst = arith.constant dense<0.000000e+00> : vector<16x128xf32>
    %2 = tpu.matmul %0, %1, %cst {dimension_numbers = #tpu.dot_dimension_numbers<[1], [0], [0], [1], [0, 0, 1, 1], [], []>} : vector<16x128xbf16>, vector<128x128xbf16>, vector<16x128xf32> -> vector<16x128xf32>
    %c0_3 = arith.constant 0 : index
    %c0_4 = arith.constant 0 : index
    %3 = vector.load %arg3[%c0_3, %c0_4] : memref<1x128xf32, #tpu.memory_space<vmem>>, vector<1x128xf32>
    %4 = vector.broadcast %3 : vector<1x128xf32> to vector<16x128xf32>
    %5 = arith.addf %2, %4 : vector<16x128xf32>
    %cst_5 = arith.constant 5.000000e-01 : f32
    %6 = vector.broadcast %cst_5 : f32 to vector<16x128xf32>
    %7 = arith.mulf %6, %5 : vector<16x128xf32>
    %cst_6 = arith.constant 0.707106769 : f32
    %8 = vector.broadcast %cst_6 : f32 to vector<16x128xf32>
    %9 = arith.mulf %5, %8 : vector<16x128xf32>
    %10 = math.erf %9 : vector<16x128xf32>
    %cst_7 = arith.constant 1.000000e+00 : f32
    %11 = vector.broadcast %cst_7 : f32 to vector<16x128xf32>
    %12 = arith.addf %11, %10 : vector<16x128xf32>
    %13 = arith.mulf %7, %12 : vector<16x128xf32>
    %14 = arith.truncf %13 : vector<16x128xf32> to vector<16x128xbf16>
    %c0_8 = arith.constant 0 : index
    %c0_9 = arith.constant 0 : index
    %15 = vector.load %arg4[%c0_8, %c0_9] : memref<128x128xbf16, #tpu.memory_space<vmem>>, vector<128x128xbf16>
    %cst_10 = arith.constant dense<0.000000e+00> : vector<16x128xf32>
    %16 = tpu.matmul %14, %15, %cst_10 {dimension_numbers = #tpu.dot_dimension_numbers<[1], [0], [0], [1], [0, 0, 1, 1], [], []>} : vector<16x128xbf16>, vector<128x128xbf16>, vector<16x128xf32> -> vector<16x128xf32>
    %c0_11 = arith.constant 0 : index
    %c0_12 = arith.constant 0 : index
    %17 = vector.load %arg5[%c0_11, %c0_12] : memref<1x128xf32, #tpu.memory_space<vmem>>, vector<1x128xf32>
    %18 = vector.broadcast %17 : vector<1x128xf32> to vector<16x128xf32>
    %19 = arith.addf %16, %18 : vector<16x128xf32>
    %c0_13 = arith.constant 0 : index
    %c0_14 = arith.constant 0 : index
    %20 = vector.load %arg6[%c0_13, %c0_14] : memref<16x128xf32, #tpu.memory_space<vmem>>, vector<16x128xf32>
    tpu.vector_store %arg6[%c0_13, %c0_14], %19 {strides = array<i32>} : memref<16x128xf32, #tpu.memory_space<vmem>>, vector<16x128xf32>,
    return
  }
  func.func @transform_0(%arg0: i32) -> (i32, i32) {
    %c0_i32 = arith.constant 0 : i32
    %c0_i32_0 = arith.constant 0 : i32
    return %arg0, %c0_i32 : i32, i32
  }
  func.func @transform_1(%arg0: i32) -> (i32, i32) {
    %c0_i32 = arith.constant 0 : i32
    %c0_i32_0 = arith.constant 0 : i32
    %c0_i32_1 = arith.constant 0 : i32
    return %c0_i32, %c0_i32_0 : i32, i32
  }
  func.func @transform_2(%arg0: i32) -> (i32, i32) {
    %c0_i32 = arith.constant 0 : i32
    %c0_i32_0 = arith.constant 0 : i32
    %c0_i32_1 = arith.constant 0 : i32
    return %c0_i32, %c0_i32_0 : i32, i32
  }
  func.func @transform_3(%arg0: i32) -> (i32, i32) {
    %c0_i32 = arith.constant 0 : i32
    %c0_i32_0 = arith.constant 0 : i32
    %c0_i32_1 = arith.constant 0 : i32
    return %c0_i32, %c0_i32_0 : i32, i32
  }
  func.func @transform_4(%arg0: i32) -> (i32, i32) {
    %c0_i32 = arith.constant 0 : i32
    %c0_i32_0 = arith.constant 0 : i32
    %c0_i32_1 = arith.constant 0 : i32
    return %c0_i32, %c0_i32_0 : i32, i32
  }
  func.func @transform_5(%arg0: i32) -> (i32, i32) {
    %c0_i32 = arith.constant 0 : i32
    %c0_i32_0 = arith.constant 0 : i32
    return %arg0, %c0_i32 : i32, i32
  }
}

</mosaic_0001>

<bundles_post_ra>
// kernel: tpu_custom_call.1
= control target key start
LH: loop header
LB: loop body
LE: loop exit
PB: predicated region body
PF: predicated region fallthrough
CT: control target
= control target key end

     0   :  { %10 = vsyncpa [#allocation3], 0  ;;  %s578_s0 = inlined_call_operand.hbm [shape: bf16[16,128], index: 0, kind: input, shape index: {}]   ;;  %s579_s1 = inlined_call_operand.hbm [shape: bf16[128,128], index: 1, kind: input, shape index: {}]   ;;  %s580_s2 = inlined_call_operand.vmem [shape: f32[1,128], index: 2, kind: input, shape index: {}]   ;;  %s581_s3 = inlined_call_operand.hbm [shape: bf16[128,128], index: 3, kind: input, shape index: {}]   ;;  %s582_s4 = inlined_call_operand.vmem [shape: f32[1,128], index: 4, kind: input, shape index: {}]   ;;  %s583_s5 = inlined_call_operand.hbm [shape: f32[16,128], index: 5, kind: output, shape index: {}]  }
   0x1   :  { %11 = vsyncpa [#allocation6], 0 }
   0x2   :  { %12 = vsyncpa [#allocation4], 0  ;;  %s520_s18 = smov [#allocation5]   ;;  %s521_s20 = smov [#allocation2]  }
   0x3   :  { %s30_s19 = sshll.u32 %s520_s18, 4  ;;  %s18_s21 = sshll.u32 %s521_s20, 4  ;;  %s31_s19 = int_to_ptr.vmem [resolvable:$true] %s30_s19  ;;  %s19_s21 = int_to_ptr.vmem [resolvable:$true] %s18_s21 }
   0x4   :  { %s442_s22 = scalar_lea.vmem %s31_s19, 1024  ;;  %p447_p1 = scmp.lt.s32.totalorder %s31_s19, %s31_s19 }
   0x5   :  { %p443_p0 = scmp.ne.s32.totalorder %s31_s19, %s442_s22  ;;  %p448_p2 = scmp.lt.s32.totalorder %s442_s22, %s442_s22 }
   0x7   :  { %p449_p3 = por %p448_p2, %p447_p1 }
   0x9   :  { %p450_p4 = pnand %p449_p3, %p443_p0 }
   0xb   :  { %453 = shalt.err (!%p450_p4)
}
   0xc   :  { %s522_s23 = smov 64   ;;  %s523_s24 = smov 4  }
   0xd   :  { %36 = dma.hbm_to_vmem [thread:$0]  %s579_s1, 1024, %s31_s19, [#allocation6], %s522_s23, %s522_s23, %s523_s24  }
   0xe   :  { %s462_s27 = scalar_lea.vmem %s19_s21, 128  ;;  %p467_p6 = scmp.lt.s32.totalorder %s19_s21, %s19_s21 }
   0xf   :  { %p463_p5 = scmp.ne.s32.totalorder %s19_s21, %s462_s27  ;;  %p468_p7 = scmp.lt.s32.totalorder %s462_s27, %s462_s27 }
  0x11   :  { %p469_p8 = por %p468_p7, %p467_p6 }
  0x13   :  { %p470_p9 = pnand %p469_p8, %p463_p5 }
  0x15   :  { %473 = shalt.err (!%p470_p9)
}
  0x16   :  { %24 = dma.hbm_to_vmem [thread:$0]  %s578_s0, 128, %s19_s21, [#allocation3], %s522_s23, %s522_s23, %s523_s24  }
  0x17   :  { %s524_s30 = smov [#allocation7]  }
  0x18   :  { %s44_s6 = sshll.u32 %s524_s30, 4  ;;  %s45_s6 = int_to_ptr.vmem [resolvable:$true] %s44_s6 }
  0x19   :  { %s482_s7 = scalar_lea.vmem %s45_s6, 1024  ;;  %p487_p11 = scmp.lt.s32.totalorder %s45_s6, %s45_s6 }
  0x1a   :  { %p483_p10 = scmp.ne.s32.totalorder %s45_s6, %s482_s7  ;;  %p488_p12 = scmp.lt.s32.totalorder %s482_s7, %s482_s7 }
  0x1c   :  { %p489_p13 = por %p488_p12, %p487_p11 }
  0x1e   :  { %p490_p0 = pnand %p489_p13, %p483_p10 }
  0x20   :  { %493 = shalt.err (!%p490_p0)
}
  0x21   :  { %50 = dma.hbm_to_vmem [thread:$0]  %s581_s3, 1024, %s45_s6, [#allocation6], %s522_s23, %s522_s23, %s523_s24  }
  0x22   :  { %514 = dma.done.wait [#allocation3], 128  }
  0x23   :  { %515 = vsyncadd [#allocation3], 4294967168 }
  0x24   :  { %516 = dma.done.wait [#allocation6], 2048  }
  0x25   :  { %517 = vsyncadd [#allocation6], 4294965248  ;;  %v525_v0 = vmov 0.0   ;;  %vm526_vm0 = vmmov 0   ;;  %v413_v1 = vld [vmem:[#allocation5 + $0x38] sm:$0xff]   ;;  %v414_v2 = vld [vmem:[#allocation5 + $0x30] sm:$0xff]  }
  0x26   :  { %363 = vmatprep.subr.bf16.mxu0 %v525_v0  ;;  %379 = vmatprep.mubr.msk.bf16.mxu0 %vm526_vm0, %v525_v0  ;;  %v415_v3 = vld [vmem:[#allocation5 + $0x28] sm:$0xff]   ;;  %v422_v4 = vld [vmem:[#allocation7 + $0x38] sm:$0xff]   ;;  %v416_v5 = vld [vmem:[#allocation5 + $0x20] sm:$0xff]   ;;  %s527_s10 = smov [#allocation8]  }
  0x27   :  { %383 = vmatprep.subr.bf16.mxu1 %v525_v0  ;;  %399 = vmatprep.mubr.msk.bf16.mxu1 %vm526_vm0, %v525_v0  ;;  %v417_v6 = vld [vmem:[#allocation5 + $0x18] sm:$0xff]   ;;  %v418_v7 = vld [vmem:[#allocation5 + $0x10] sm:$0xff]   ;;  %v419_v8 = vld [vmem:[#allocation5 + $0x8] sm:$0xff]   ;;  %s313_s11 = sshll.u32 %s527_s10, 4  ;;  %s314_s11 = int_to_ptr.vmem [resolvable:$true] %s313_s11 }
  0x28   :  { %364 = vmatpush3.bf16.msra.mxu0 %v413_v1  ;;  %384 = vmatpush3.bf16.msra.mxu1 %v422_v4  ;;  %v420_v9 = vld [vmem:[#allocation5] sm:$0xff]   ;;  %v421_v10 = vld [vmem:[#allocation2] sm:$0xff]   ;;  %v423_v11 = vld [vmem:[#allocation7 + $0x30] sm:$0xff]   ;;  %s494_s12 = scalar_lea.vmem %s314_s11, 256  ;;  %p499_p2 = scmp.lt.s32.totalorder %s314_s11, %s314_s11 }
  0x29   :  { %365 = vmatprep.subr.bf16.mxu0 %v525_v0  ;;  %385 = vmatprep.subr.bf16.mxu1 %v525_v0  ;;  %v424_v12 = vld [vmem:[#allocation7 + $0x28] sm:$0xff]   ;;  %v425_v13 = vld [vmem:[#allocation7 + $0x20] sm:$0xff]   ;;  %v426_v14 = vld [vmem:[#allocation7 + $0x18] sm:$0xff]   ;;  %p495_p1 = scmp.ne.s32.totalorder %s314_s11, %s494_s12  ;;  %p500_p3 = scmp.lt.s32.totalorder %s494_s12, %s494_s12 }
  0x2a   :  { %v427_v15 = vld [vmem:[#allocation7 + $0x10] sm:$0xff]   ;;  %v428_v16 = vld [vmem:[#allocation7 + $0x8] sm:$0xff]   ;;  %v429_v17 = vld [vmem:[#allocation7] sm:$0xff]  }
  0x2b   :  { %v326_v18 = vld [vmem:[%s580_s2] ss:$0 sm:$0xff]  ;;  %p501_p4 = por %p500_p3, %p499_p2 }
  0x2c   :  { %366 = vmatpush3.bf16.msra.mxu0 %v414_v2  ;;  %386 = vmatpush3.bf16.msra.mxu1 %v423_v11  ;;  %v336_v36 = vld [vmem:[%s582_s4] ss:$0 sm:$0xff] }
  0x2d   :  { %367 = vmatprep.subr.bf16.mxu0 %v525_v0  ;;  %387 = vmatprep.subr.bf16.mxu1 %v525_v0  ;;  %p502_p5 = pnand %p501_p4, %p495_p1 }
  0x30   :  { %368 = vmatpush3.bf16.msra.mxu0 %v415_v3  ;;  %388 = vmatpush3.bf16.msra.mxu1 %v424_v12 }
  0x31   :  { %369 = vmatprep.subr.bf16.mxu0 %v525_v0  ;;  %389 = vmatprep.subr.bf16.mxu1 %v525_v0 }
  0x34   :  { %370 = vmatpush3.bf16.msra.mxu0 %v416_v5  ;;  %390 = vmatpush3.bf16.msra.mxu1 %v425_v13 }
  0x35   :  { %371 = vmatprep.subr.bf16.mxu0 %v525_v0  ;;  %391 = vmatprep.subr.bf16.mxu1 %v525_v0 }
  0x38   :  { %372 = vmatpush3.bf16.msra.mxu0 %v417_v6  ;;  %392 = vmatpush3.bf16.msra.mxu1 %v426_v14 }
  0x39   :  { %373 = vmatprep.subr.bf16.mxu0 %v525_v0  ;;  %393 = vmatprep.subr.bf16.mxu1 %v525_v0 }
  0x3c   :  { %374 = vmatpush3.bf16.msra.mxu0 %v418_v7  ;;  %394 = vmatpush3.bf16.msra.mxu1 %v427_v15 }
  0x3d   :  { %375 = vmatprep.subr.bf16.mxu0 %v525_v0  ;;  %395 = vmatprep.subr.bf16.mxu1 %v525_v0 }
  0x40   :  { %376 = vmatpush3.bf16.msra.mxu0 %v419_v8  ;;  %396 = vmatpush3.bf16.msra.mxu1 %v428_v16 }
  0x41   :  { %377 = vmatprep.subr.bf16.mxu0 %v525_v0  ;;  %397 = vmatprep.subr.bf16.mxu1 %v525_v0 }
  0x44   :  { %378 = vmatpush3.bf16.msra.mxu0 %v420_v9  ;;  %398 = vmatpush3.bf16.msra.mxu1 %v429_v17 }
  0x47   :  { %380 = vmatmul.mubr.bf16.vlgmr.msra.gmra.mxu0 %v421_v10 }
 0x107   :  { %v176_v19 = vpop.f32.mrf.mxu0 }
 0x108   :  { %v177_v20 = vadd.f32 %v326_v18, %v176_v19 }
 0x109   :  { %v381_v21 = vpop.f32.mrf.mxu0 }
 0x10a   :  { %v185_v22 = vmul.f32 0.70710677, %v177_v20  ;;  %v183_v30 = vmul.f32 0.5, %v177_v20 }
 0x10b   :  { %v179_v23 = vpop.f32.mrf.mxu0 }
 0x10c   :  { %430 = verf.f32 %v185_v22  ;;  %v180_v24 = vadd.f32 %v326_v18, %v179_v23 }
 0x10d   :  { %v382_v25 = vpop.f32.mrf.mxu0 }
 0x10e   :  { %v186_v26 = vmul.f32 0.70710677, %v180_v24  ;;  %v184_v31 = vmul.f32 0.5, %v180_v24 }
 0x110   :  { %432 = verf.f32 %v186_v26 }
 0x119   :  { %v431_v27 = vpop.eup %430 }
 0x11a   :  { %v189_v28 = vadd.f32 1.0, %v431_v27 }
 0x11c   :  { %v191_v33 = vmul.f32 %v189_v28, %v183_v30 }
 0x11d   :  { %v433_v29 = vpop.eup %432 }
 0x11e   :  { %v190_v32 = vadd.f32 1.0, %v433_v29 }
 0x120   :  { %v192_v34 = vmul.f32 %v190_v32, %v184_v31 }
 0x122   :  { %v193_v35 = vpack.c.bf16 %v192_v34, %v191_v33 }
 0x124   :  { %400 = vmatmul.mubr.bf16.vlgmr.msra.gmra.mxu1 %v193_v35 }
 0x1e4   :  { %v299_v37 = vpop.f32.mrf.mxu1 }
 0x1e5   :  { %v300_v38 = vadd.f32 %v336_v36, %v299_v37 }
 0x1e6   :  { %v401_v39 = vpop.f32.mrf.mxu1 }
 0x1e7   :  { %306 = vst [vmem:[#allocation8] sm:$0xff] %v300_v38 }
 0x1e8   :  { %v302_v40 = vpop.f32.mrf.mxu1 }
 0x1e9   :  { %v303_v41 = vadd.f32 %v336_v36, %v302_v40 }
 0x1ea   :  { %v402_v42 = vpop.f32.mrf.mxu1 }
 0x1eb   :  { %307 = vst [vmem:[#allocation8 + $0x8] sm:$0xff] %v303_v41 }
 0x1ec   :  { %505 = shalt.err (!%p502_p5)
}
 0x1ed   :  { %s528_s13 = smov 128   ;;  %s529_s4 = smov 8  }
 0x1ee   :  { %319 = dma.vmem_to_hbm [thread:$0]  %s314_s11, 256, %s583_s5, [#allocation4], %s528_s13, %s528_s13, %s529_s4  }
 0x1ef   :  { %518 = dma.done.wait [#allocation4], 256  }
 0x1f0   :  { %519 = vsyncadd [#allocation4], 4294967040 }
 0x1f1   :  { %323 = vsyncpa [#allocation3], 1 }
 0x1f2   :  { %324 = vsyncpa [#allocation6], 1 }
 0x1f3   :  { %325 = vsyncpa [#allocation4], 1 }

</bundles_post_ra>
